<compile_context>
chip_gen: v6e
topology: v6e:2x2x1
jax: 0.10.0
libtpu: 0.0.40
codegen_flags: <defaults>
</compile_context>

<pallas_src>
import functools

import jax
import jax.numpy as jnp
from jax.experimental import pallas as pl
from jax.experimental.pallas import tpu as pltpu

F_PAD = 128   # lane-dense conv output width
O_PAD = 128   # lane-dense final output width


def _cnn_kernel(filter_sizes, emb_ref, *refs):
    """Fused im2col-conv bank + max-pool-over-time + bias/ReLU + FC.

    refs = (w0, b0, w1, b1, ..., fc_w, fc_b, out_ref)
      w_i : (fs_i*E, F_pad)   bf16 conv weight, rows ordered (tap k, channel e)
      b_i : (1, F_pad)        f32 conv bias (zero-padded)
      fc_w: (n_fs*F_pad, O_pad) bf16 linear weight (zero rows for padded feats)
      fc_b: (1, O_pad)        f32 linear bias (zero-padded)
    """
    n_fs = len(filter_sizes)
    conv_w_refs = refs[0:2 * n_fs:2]
    conv_b_refs = refs[1:2 * n_fs:2]
    fc_w_ref = refs[2 * n_fs]
    fc_b_ref = refs[2 * n_fs + 1]
    out_ref = refs[2 * n_fs + 2]

    emb = emb_ref[...]                               # (TB, S, E) bf16
    _, S, _ = emb.shape

    pooled = []
    for idx, fs in enumerate(filter_sizes):
        L = S - fs + 1                               # valid conv output length
        # im2col: concat fs shifted windows on the channel axis -> (TB, L, fs*E).
        cols = jnp.concatenate([emb[:, k:k + L, :] for k in range(fs)], axis=-1)
        # Single MXU matmul per filter bank: K = fs*E, N = F_pad (lane-dense).
        conv = jax.lax.dot_general(
            cols, conv_w_refs[idx][...],
            dimension_numbers=(((2,), (0,)), ((), ())),
            preferred_element_type=jnp.float32)      # (TB, L, F_pad) f32
        # Max-pool over time first, then bias + ReLU (exact: bias is
        # time-invariant and ReLU is monotone).
        p = jnp.max(conv, axis=1)                    # (TB, F_pad)
        p = jnp.maximum(p + conv_b_refs[idx][...], 0.0)
        pooled.append(p)

    cat = jnp.concatenate(pooled, axis=-1)           # (TB, n_fs*F_pad) f32
    # dropout == identity in eval mode
    logits = jax.lax.dot_general(
        cat.astype(jnp.bfloat16), fc_w_ref[...],
        dimension_numbers=(((1,), (0,)), ((), ())),
        preferred_element_type=jnp.float32) + fc_b_ref[...]
    out_ref[...] = logits                            # (TB, O_pad)


def _pick_batch_tile(B, S, E, f_pad, filter_sizes, budget_bytes=24 << 20):
    """Batch tile sized to stay well under the scoped VMEM limit (v7x-safe)."""
    if B <= 8:
        return B
    per_row = 2 * (S * E * 2)                        # double-buffered bf16 input
    for fs in filter_sizes:
        L = S - fs + 1
        per_row += L * fs * E * 2                    # im2col temp (bf16)
        per_row += L * f_pad * 4                     # conv output (f32)
    tb = int(budget_bytes // max(per_row, 1))
    tb = max(8, (tb // 8) * 8)                       # sublane-friendly
    return min(tb, max(8, (B // 8) * 8))


def pack_params(params, filter_sizes, f_pad=F_PAD, o_pad=O_PAD):
    """Transpose / pad / cast PyTorch-layout params into kernel layout."""
    E = params["embedding"].shape[1]
    n_fs = len(filter_sizes)
    packed = {"embedding": params["embedding"].astype(jnp.bfloat16)}
    n_filters = params["conv_w0"].shape[0]
    for i, fs in enumerate(filter_sizes):
        w_pt = params[f"conv_w{i}"]                  # (F, E, fs) PyTorch Conv1d
        # (F, E, fs) -> (fs, E, F) -> (fs*E, F); row index = k*E + e matches the
        # im2col concatenation order in the kernel.
        w = jnp.transpose(w_pt, (2, 1, 0)).reshape(fs * E, n_filters)
        w = jnp.pad(w, ((0, 0), (0, f_pad - n_filters)))
        packed[f"conv_w{i}"] = w.astype(jnp.bfloat16)
        b = jnp.pad(params[f"conv_b{i}"], (0, f_pad - n_filters))
        packed[f"conv_b{i}"] = b.reshape(1, f_pad).astype(jnp.float32)

    fc_w_pt = params["fc_w"]                         # (O, n_fs*F) PyTorch Linear
    O = fc_w_pt.shape[0]
    fc_w = jnp.transpose(fc_w_pt)                    # (n_fs*F, O)
    fc_w_padded = jnp.zeros((n_fs * f_pad, o_pad), jnp.float32)
    for i in range(n_fs):
        fc_w_padded = fc_w_padded.at[
            i * f_pad:i * f_pad + n_filters, :O].set(
                fc_w[i * n_filters:(i + 1) * n_filters, :])
    packed["fc_w"] = fc_w_padded.astype(jnp.bfloat16)
    packed["fc_b"] = jnp.pad(params["fc_b"], (0, o_pad - O)).reshape(
        1, o_pad).astype(jnp.float32)
    return packed


def cnn_forward(text, packed, filter_sizes, output_dim):
    """text: (B, S) int32 token ids.  Returns (B, output_dim) f32 logits."""
    # Embedding lookup (gather); padding_idx row is zeroed at init.  Table and
    # activation are bf16 to halve HBM traffic of the (B,S,E) round trip.
    # TODO(synk): fuse the gather into the kernel (scalar-prefetched ids + DMA
    # gather from an HBM-resident table) to remove this HBM round trip entirely.
    embedded = jnp.take(packed["embedding"], text, axis=0)   # (B, S, E) bf16
    B, S, E = embedded.shape
    n_fs = len(filter_sizes)
    f_pad = packed["conv_w0"].shape[1]
    o_pad = packed["fc_b"].shape[1]
    if S < max(filter_sizes):
        raise ValueError("sequence length must be >= max(filter_sizes)")

    TB = _pick_batch_tile(B, S, E, f_pad, filter_sizes)
    grid = (pl.cdiv(B, TB),)

    inputs = [embedded]
    in_specs = [pl.BlockSpec((TB, S, E), lambda b: (b, 0, 0))]
    for i in range(n_fs):
        w = packed[f"conv_w{i}"]
        bias = packed[f"conv_b{i}"]
        inputs += [w, bias]
        in_specs += [pl.BlockSpec(w.shape, lambda b: (0, 0)),
                     pl.BlockSpec(bias.shape, lambda b: (0, 0))]
    inputs += [packed["fc_w"], packed["fc_b"]]
    in_specs += [pl.BlockSpec(packed["fc_w"].shape, lambda b: (0, 0)),
                 pl.BlockSpec(packed["fc_b"].shape, lambda b: (0, 0))]

    # Advisory cost estimate for the XLA scheduler.
    flops = 2 * B * (n_fs * f_pad) * o_pad
    bytes_accessed = embedded.size * embedded.dtype.itemsize + B * o_pad * 4
    for fs in filter_sizes:
        flops += 2 * B * (S - fs + 1) * (fs * E) * f_pad
    for i in range(n_fs):
        for k in (f"conv_w{i}", f"conv_b{i}"):
            bytes_accessed += packed[k].size * packed[k].dtype.itemsize
    for k in ("fc_w", "fc_b"):
        bytes_accessed += packed[k].size * packed[k].dtype.itemsize

    kernel = functools.partial(_cnn_kernel, tuple(filter_sizes))
    out_padded = pl.pallas_call(
        kernel,
        out_shape=jax.ShapeDtypeStruct((B, o_pad), jnp.float32),
        grid=grid,
        in_specs=in_specs,
        out_specs=pl.BlockSpec((TB, o_pad), lambda b: (b, 0)),
        compiler_params=pltpu.CompilerParams(
            dimension_semantics=("parallel",),
            vmem_limit_bytes=48 * 1024 * 1024),
        cost_estimate=pl.CostEstimate(
            flops=flops, transcendentals=0, bytes_accessed=bytes_accessed),
    )(*inputs)
    return out_padded[:, :output_dim]


def init_params(key, vocab_size, embedding_dim, n_filters, filter_sizes,
                output_dim, pad_idx):
    """PyTorch-layout parameters (Conv1d: (F, E, fs), Linear: (O, n_fs*F))."""
    keys = jax.random.split(key, 2 + 2 * len(filter_sizes) + 2)
    params = {}
    emb = 0.02 * jax.random.normal(keys[0], (vocab_size, embedding_dim),
                                   jnp.float32)
    params["embedding"] = emb.at[pad_idx].set(0.0)       # padding_idx=pad_idx
    for i, fs in enumerate(filter_sizes):
        params[f"conv_w{i}"] = 0.1 * jax.random.normal(
            keys[2 + 2 * i], (n_filters, embedding_dim, fs), jnp.float32)
        params[f"conv_b{i}"] = 0.1 * jax.random.normal(
            keys[3 + 2 * i], (n_filters,), jnp.float32)
    params["fc_w"] = 0.1 * jax.random.normal(
        keys[-2], (output_dim, len(filter_sizes) * n_filters), jnp.float32)
    params["fc_b"] = 0.1 * jax.random.normal(keys[-1], (output_dim,),
                                             jnp.float32)
    return params


if __name__ == "__main__":
    # Small, module-consistent shapes.
    vocab_size = 50
    embedding_dim = 32
    n_filters = 8
    filter_sizes = (2, 3, 4)
    output_dim = 4
    pad_idx = 0
    batch, seq = 2, 16

    key = jax.random.PRNGKey(0)
    k_param, k_text = jax.random.split(key)
    params = init_params(k_param, vocab_size, embedding_dim, n_filters,
                         filter_sizes, output_dim, pad_idx)
    packed = pack_params(params, filter_sizes)
    text = jax.random.randint(k_text, (batch, seq), 0, vocab_size, jnp.int32)

    logits = cnn_forward(text, packed, filter_sizes, output_dim)
    jax.block_until_ready(logits)
    assert logits.shape == (batch, output_dim)
    print("KERNEL_OK")
</pallas_src>

<mosaic_0001>
module attributes {stable_mosaic.version = 11 : i64} {
  func.func @_cnn_kernel(%arg0: i32, %arg1: memref<2x16x32xbf16, #tpu.memory_space<vmem>>, %arg2: memref<64x128xbf16, #tpu.memory_space<vmem>>, %arg3: memref<1x128xf32, #tpu.memory_space<vmem>>, %arg4: memref<96x128xbf16, #tpu.memory_space<vmem>>, %arg5: memref<1x128xf32, #tpu.memory_space<vmem>>, %arg6: memref<128x128xbf16, #tpu.memory_space<vmem>>, %arg7: memref<1x128xf32, #tpu.memory_space<vmem>>, %arg8: memref<384x128xbf16, #tpu.memory_space<vmem>>, %arg9: memref<1x128xf32, #tpu.memory_space<vmem>>, %arg10: memref<2x128xf32, #tpu.memory_space<vmem>>) attributes {dimension_semantics = [#tpu.dimension_semantics<parallel>], iteration_bounds = array<i64: 1>, scalar_prefetch = 0 : i64, scratch_operands = 0 : i64, tpu.core_type = #tpu.core_type<tc>, window_params = [{transform_indices = @transform_0, window_bounds = array<i64: 2, 16, 32>}, {pipeline_mode = #tpu.pipeline_mode<synchronous>, transform_indices = @transform_1, window_bounds = array<i64: 64, 128>}, {pipeline_mode = #tpu.pipeline_mode<synchronous>, transform_indices = @transform_2, window_bounds = array<i64: 1, 128>}, {pipeline_mode = #tpu.pipeline_mode<synchronous>, transform_indices = @transform_3, window_bounds = array<i64: 96, 128>}, {pipeline_mode = #tpu.pipeline_mode<synchronous>, transform_indices = @transform_4, window_bounds = array<i64: 1, 128>}, {pipeline_mode = #tpu.pipeline_mode<synchronous>, transform_indices = @transform_5, window_bounds = array<i64: 128, 128>}, {pipeline_mode = #tpu.pipeline_mode<synchronous>, transform_indices = @transform_6, window_bounds = array<i64: 1, 128>}, {pipeline_mode = #tpu.pipeline_mode<synchronous>, transform_indices = @transform_7, window_bounds = array<i64: 384, 128>}, {pipeline_mode = #tpu.pipeline_mode<synchronous>, transform_indices = @transform_8, window_bounds = array<i64: 1, 128>}, {transform_indices = @transform_9, window_bounds = array<i64: 2, 128>}]} {
    %c0 = arith.constant 0 : index
    %c0_0 = arith.constant 0 : index
    %c0_1 = arith.constant 0 : index
    %0 = vector.load %arg1[%c0, %c0_0, %c0_1] : memref<2x16x32xbf16, #tpu.memory_space<vmem>>, vector<2x16x32xbf16>
    %1 = vector.extract_strided_slice %0 {offsets = [0, 0, 0], sizes = [2, 15, 32], strides = [1, 1, 1]} : vector<2x16x32xbf16> to vector<2x15x32xbf16>
    %2 = vector.extract_strided_slice %0 {offsets = [0, 1, 0], sizes = [2, 15, 32], strides = [1, 1, 1]} : vector<2x16x32xbf16> to vector<2x15x32xbf16>
    %3 = tpu.concatenate %1, %2 in 2 : vector<2x15x32xbf16>, vector<2x15x32xbf16> -> vector<2x15x64xbf16>
    %c0_2 = arith.constant 0 : index
    %c0_3 = arith.constant 0 : index
    %4 = vector.load %arg2[%c0_2, %c0_3] : memref<64x128xbf16, #tpu.memory_space<vmem>>, vector<64x128xbf16>
    %cst = arith.constant dense<0.000000e+00> : vector<2x15x128xf32>
    %5 = tpu.matmul %3, %4, %cst {dimension_numbers = #tpu.dot_dimension_numbers<[2], [0], [0, 1], [1], [0, 0, 0, 1, 1, 1], [], []>} : vector<2x15x64xbf16>, vector<64x128xbf16>, vector<2x15x128xf32> -> vector<2x15x128xf32>
    %cst_4 = arith.constant dense<0xFF800000> : vector<2x128xf32>
    %6 = vector.multi_reduction <maximumf>, %5, %cst_4 [1] : vector<2x15x128xf32> to vector<2x128xf32>
    %c0_5 = arith.constant 0 : index
    %c0_6 = arith.constant 0 : index
    %7 = vector.load %arg3[%c0_5, %c0_6] : memref<1x128xf32, #tpu.memory_space<vmem>>, vector<1x128xf32>
    %8 = vector.broadcast %7 : vector<1x128xf32> to vector<2x128xf32>
    %9 = arith.addf %6, %8 : vector<2x128xf32>
    %cst_7 = arith.constant 0.000000e+00 : f32
    %10 = vector.broadcast %cst_7 : f32 to vector<2x128xf32>
    %11 = arith.maximumf %9, %10 : vector<2x128xf32>
    %12 = vector.extract_strided_slice %0 {offsets = [0, 0, 0], sizes = [2, 14, 32], strides = [1, 1, 1]} : vector<2x16x32xbf16> to vector<2x14x32xbf16>
    %13 = vector.extract_strided_slice %0 {offsets = [0, 1, 0], sizes = [2, 14, 32], strides = [1, 1, 1]} : vector<2x16x32xbf16> to vector<2x14x32xbf16>
    %14 = vector.extract_strided_slice %0 {offsets = [0, 2, 0], sizes = [2, 14, 32], strides = [1, 1, 1]} : vector<2x16x32xbf16> to vector<2x14x32xbf16>
    %15 = tpu.concatenate %12, %13, %14 in 2 : vector<2x14x32xbf16>, vector<2x14x32xbf16>, vector<2x14x32xbf16> -> vector<2x14x96xbf16>
    %c0_8 = arith.constant 0 : index
    %c0_9 = arith.constant 0 : index
    %16 = vector.load %arg4[%c0_8, %c0_9] : memref<96x128xbf16, #tpu.memory_space<vmem>>, vector<96x128xbf16>
    %cst_10 = arith.constant dense<0.000000e+00> : vector<2x14x128xf32>
    %17 = tpu.matmul %15, %16, %cst_10 {dimension_numbers = #tpu.dot_dimension_numbers<[2], [0], [0, 1], [1], [0, 0, 0, 1, 1, 1], [], []>} : vector<2x14x96xbf16>, vector<96x128xbf16>, vector<2x14x128xf32> -> vector<2x14x128xf32>
    %cst_11 = arith.constant dense<0xFF800000> : vector<2x128xf32>
    %18 = vector.multi_reduction <maximumf>, %17, %cst_11 [1] : vector<2x14x128xf32> to vector<2x128xf32>
    %c0_12 = arith.constant 0 : index
    %c0_13 = arith.constant 0 : index
    %19 = vector.load %arg5[%c0_12, %c0_13] : memref<1x128xf32, #tpu.memory_space<vmem>>, vector<1x128xf32>
    %20 = vector.broadcast %19 : vector<1x128xf32> to vector<2x128xf32>
    %21 = arith.addf %18, %20 : vector<2x128xf32>
    %cst_14 = arith.constant 0.000000e+00 : f32
    %22 = vector.broadcast %cst_14 : f32 to vector<2x128xf32>
    %23 = arith.maximumf %21, %22 : vector<2x128xf32>
    %24 = vector.extract_strided_slice %0 {offsets = [0, 0, 0], sizes = [2, 13, 32], strides = [1, 1, 1]} : vector<2x16x32xbf16> to vector<2x13x32xbf16>
    %25 = vector.extract_strided_slice %0 {offsets = [0, 1, 0], sizes = [2, 13, 32], strides = [1, 1, 1]} : vector<2x16x32xbf16> to vector<2x13x32xbf16>
    %26 = vector.extract_strided_slice %0 {offsets = [0, 2, 0], sizes = [2, 13, 32], strides = [1, 1, 1]} : vector<2x16x32xbf16> to vector<2x13x32xbf16>
    %27 = vector.extract_strided_slice %0 {offsets = [0, 3, 0], sizes = [2, 13, 32], strides = [1, 1, 1]} : vector<2x16x32xbf16> to vector<2x13x32xbf16>
    %28 = tpu.concatenate %24, %25, %26, %27 in 2 : vector<2x13x32xbf16>, vector<2x13x32xbf16>, vector<2x13x32xbf16>, vector<2x13x32xbf16> -> vector<2x13x128xbf16>
    %c0_15 = arith.constant 0 : index
    %c0_16 = arith.constant 0 : index
    %29 = vector.load %arg6[%c0_15, %c0_16] : memref<128x128xbf16, #tpu.memory_space<vmem>>, vector<128x128xbf16>
    %cst_17 = arith.constant dense<0.000000e+00> : vector<2x13x128xf32>
    %30 = tpu.matmul %28, %29, %cst_17 {dimension_numbers = #tpu.dot_dimension_numbers<[2], [0], [0, 1], [1], [0, 0, 0, 1, 1, 1], [], []>} : vector<2x13x128xbf16>, vector<128x128xbf16>, vector<2x13x128xf32> -> vector<2x13x128xf32>
    %cst_18 = arith.constant dense<0xFF800000> : vector<2x128xf32>
    %31 = vector.multi_reduction <maximumf>, %30, %cst_18 [1] : vector<2x13x128xf32> to vector<2x128xf32>
    %c0_19 = arith.constant 0 : index
    %c0_20 = arith.constant 0 : index
    %32 = vector.load %arg7[%c0_19, %c0_20] : memref<1x128xf32, #tpu.memory_space<vmem>>, vector<1x128xf32>
    %33 = vector.broadcast %32 : vector<1x128xf32> to vector<2x128xf32>
    %34 = arith.addf %31, %33 : vector<2x128xf32>
    %cst_21 = arith.constant 0.000000e+00 : f32
    %35 = vector.broadcast %cst_21 : f32 to vector<2x128xf32>
    %36 = arith.maximumf %34, %35 : vector<2x128xf32>
    %37 = tpu.concatenate %11, %23, %36 in 1 : vector<2x128xf32>, vector<2x128xf32>, vector<2x128xf32> -> vector<2x384xf32>
    %38 = arith.truncf %37 : vector<2x384xf32> to vector<2x384xbf16>
    %c0_22 = arith.constant 0 : index
    %c0_23 = arith.constant 0 : index
    %39 = vector.load %arg8[%c0_22, %c0_23] : memref<384x128xbf16, #tpu.memory_space<vmem>>, vector<384x128xbf16>
    %cst_24 = arith.constant dense<0.000000e+00> : vector<2x128xf32>
    %40 = tpu.matmul %38, %39, %cst_24 {dimension_numbers = #tpu.dot_dimension_numbers<[1], [0], [0], [1], [0, 0, 1, 1], [], []>} : vector<2x384xbf16>, vector<384x128xbf16>, vector<2x128xf32> -> vector<2x128xf32>
    %c0_25 = arith.constant 0 : index
    %c0_26 = arith.constant 0 : index
    %41 = vector.load %arg9[%c0_25, %c0_26] : memref<1x128xf32, #tpu.memory_space<vmem>>, vector<1x128xf32>
    %42 = vector.broadcast %41 : vector<1x128xf32> to vector<2x128xf32>
    %43 = arith.addf %40, %42 : vector<2x128xf32>
    %c0_27 = arith.constant 0 : index
    %c0_28 = arith.constant 0 : index
    %44 = vector.load %arg10[%c0_27, %c0_28] : memref<2x128xf32, #tpu.memory_space<vmem>>, vector<2x128xf32>
    tpu.vector_store %arg10[%c0_27, %c0_28], %43 {strides = array<i32>} : memref<2x128xf32, #tpu.memory_space<vmem>>, vector<2x128xf32>,
    return
  }
  func.func @transform_0(%arg0: i32) -> (i32, i32, i32) {
    %c0_i32 = arith.constant 0 : i32
    %c0_i32_0 = arith.constant 0 : i32
    %c0_i32_1 = arith.constant 0 : i32
    return %arg0, %c0_i32, %c0_i32_0 : i32, i32, i32
  }
  func.func @transform_1(%arg0: i32) -> (i32, i32) {
    %c0_i32 = arith.constant 0 : i32
    %c0_i32_0 = arith.constant 0 : i32
    %c0_i32_1 = arith.constant 0 : i32
    return %c0_i32, %c0_i32_0 : i32, i32
  }
  func.func @transform_2(%arg0: i32) -> (i32, i32) {
    %c0_i32 = arith.constant 0 : i32
    %c0_i32_0 = arith.constant 0 : i32
    %c0_i32_1 = arith.constant 0 : i32
    return %c0_i32, %c0_i32_0 : i32, i32
  }
  func.func @transform_3(%arg0: i32) -> (i32, i32) {
    %c0_i32 = arith.constant 0 : i32
    %c0_i32_0 = arith.constant 0 : i32
    %c0_i32_1 = arith.constant 0 : i32
    return %c0_i32, %c0_i32_0 : i32, i32
  }
  func.func @transform_4(%arg0: i32) -> (i32, i32) {
    %c0_i32 = arith.constant 0 : i32
    %c0_i32_0 = arith.constant 0 : i32
    %c0_i32_1 = arith.constant 0 : i32
    return %c0_i32, %c0_i32_0 : i32, i32
  }
  func.func @transform_5(%arg0: i32) -> (i32, i32) {
    %c0_i32 = arith.constant 0 : i32
    %c0_i32_0 = arith.constant 0 : i32
    %c0_i32_1 = arith.constant 0 : i32
    return %c0_i32, %c0_i32_0 : i32, i32
  }
  func.func @transform_6(%arg0: i32) -> (i32, i32) {
    %c0_i32 = arith.constant 0 : i32
    %c0_i32_0 = arith.constant 0 : i32
    %c0_i32_1 = arith.constant 0 : i32
    return %c0_i32, %c0_i32_0 : i32, i32
  }
  func.func @transform_7(%arg0: i32) -> (i32, i32) {
    %c0_i32 = arith.constant 0 : i32
    %c0_i32_0 = arith.constant 0 : i32
    %c0_i32_1 = arith.constant 0 : i32
    return %c0_i32, %c0_i32_0 : i32, i32
  }
  func.func @transform_8(%arg0: i32) -> (i32, i32) {
    %c0_i32 = arith.constant 0 : i32
    %c0_i32_0 = arith.constant 0 : i32
    %c0_i32_1 = arith.constant 0 : i32
    return %c0_i32, %c0_i32_0 : i32, i32
  }
  func.func @transform_9(%arg0: i32) -> (i32, i32) {
    %c0_i32 = arith.constant 0 : i32
    %c0_i32_0 = arith.constant 0 : i32
    return %arg0, %c0_i32 : i32, i32
  }
}

</mosaic_0001>

<bundles_post_ra>
// kernel: tpu_custom_call.1
= control target key start
LH: loop header
LB: loop body
LE: loop exit
PB: predicated region body
PF: predicated region fallthrough
CT: control target
= control target key end

     0   :  { %14 = vsyncpa [#allocation3], 0  ;;  %s3221_s0 = inlined_call_operand.hbm [shape: bf16[2,16,32], index: 0, kind: input, shape index: {}]   ;;  %s3222_s1 = inlined_call_operand.hbm [shape: bf16[64,128], index: 1, kind: input, shape index: {}]   ;;  %s3223_s2 = inlined_call_operand.vmem [shape: f32[1,128], index: 2, kind: input, shape index: {}]   ;;  %s3224_s3 = inlined_call_operand.hbm [shape: bf16[96,128], index: 3, kind: input, shape index: {}]   ;;  %s3225_s4 = inlined_call_operand.vmem [shape: f32[1,128], index: 4, kind: input, shape index: {}]   ;;  %s3226_s5 = inlined_call_operand.hbm [shape: bf16[128,128], index: 5, kind: input, shape index: {}]   ;;  %s3227_s6 = inlined_call_operand.vmem [shape: f32[1,128], index: 6, kind: input, shape index: {}]   ;;  %s3228_s7 = inlined_call_operand.hbm [shape: bf16[384,128], index: 7, kind: input, shape index: {}]   ;;  %s3229_s8 = inlined_call_operand.vmem [shape: f32[1,128], index: 8, kind: input, shape index: {}]   ;;  %s3230_s9 = inlined_call_operand.hbm [shape: f32[2,128], index: 9, kind: output, shape index: {}]  }
   0x1   :  { %15 = vsyncpa [#allocation6], 0 }
   0x2   :  { %16 = vsyncpa [#allocation9], 0 }
   0x3   :  { %17 = vsyncpa [#allocation4], 0  ;;  %s2791_s30 = smov [#allocation5]   ;;  %s2792_s11 = smov [#allocation8]  }
   0x4   :  { %s35_s10 = sshll.u32 %s2791_s30, 4  ;;  %s63_s12 = sshll.u32 %s2792_s11, 4  ;;  %s36_s10 = int_to_ptr.vmem [resolvable:$true] %s35_s10  ;;  %s64_s12 = int_to_ptr.vmem [resolvable:$true] %s63_s12 }
   0x5   :  { %s2671_s13 = scalar_lea.vmem %s36_s10, 512  ;;  %p2676_p1 = scmp.lt.s32.totalorder %s36_s10, %s36_s10 }
   0x6   :  { %p2672_p0 = scmp.ne.s32.totalorder %s36_s10, %s2671_s13  ;;  %p2677_p2 = scmp.lt.s32.totalorder %s2671_s13, %s2671_s13 }
   0x8   :  { %p2678_p3 = por %p2677_p2, %p2676_p1 }
   0xa   :  { %p2679_p4 = pnand %p2678_p3, %p2672_p0 }
   0xc   :  { %2682 = shalt.err (!%p2679_p4)
}
   0xd   :  { %s2793_s14 = smov 64   ;;  %s2794_s15 = smov 4  }
   0xe   :  { %41 = dma.hbm_to_vmem [thread:$0]  %s3222_s1, 512, %s36_s10, [#allocation6], %s2793_s14, %s2793_s14, %s2794_s15  }
   0xf   :  { %s2691_s18 = scalar_lea.vmem %s64_s12, 1024  ;;  %p2696_p6 = scmp.lt.s32.totalorder %s64_s12, %s64_s12 }
  0x10   :  { %p2692_p5 = scmp.ne.s32.totalorder %s64_s12, %s2691_s18  ;;  %p2697_p7 = scmp.lt.s32.totalorder %s2691_s18, %s2691_s18 }
  0x12   :  { %p2698_p8 = por %p2697_p7, %p2696_p6 }
  0x14   :  { %p2699_p9 = pnand %p2698_p8, %p2692_p5 }
  0x16   :  { %2702 = shalt.err (!%p2699_p9)
}
  0x17   :  { %69 = dma.hbm_to_vmem [thread:$0]  %s3226_s5, 1024, %s64_s12, [#allocation9], %s2793_s14, %s2793_s14, %s2794_s15  }
  0x18   :  { %s2795_s21 = smov [#allocation2]   ;;  %s2796_s23 = smov [#allocation7]  }
  0x19   :  { %s23_s22 = sshll.u32 %s2795_s21, 4  ;;  %s49_s24 = sshll.u32 %s2796_s23, 4  ;;  %s24_s22 = int_to_ptr.vmem [resolvable:$true] %s23_s22  ;;  %s50_s24 = int_to_ptr.vmem [resolvable:$true] %s49_s24 }
  0x1a   :  { %s2711_s1 = scalar_lea.vmem %s24_s22, 256  ;;  %p2716_p11 = scmp.lt.s32.totalorder %s24_s22, %s24_s22 }
  0x1b   :  { %p2712_p10 = scmp.ne.s32.totalorder %s24_s22, %s2711_s1  ;;  %p2717_p12 = scmp.lt.s32.totalorder %s2711_s1, %s2711_s1 }
  0x1d   :  { %p2718_p13 = por %p2717_p12, %p2716_p11 }
  0x1f   :  { %p2719_p0 = pnand %p2718_p13, %p2712_p10 }
  0x21   :  { %2722 = shalt.err (!%p2719_p0)
}
  0x22   :  { %29 = dma.hbm_to_vmem [thread:$0]  %s3221_s0, 256, %s24_s22, [#allocation3], %s2793_s14, %s2793_s14, %s2794_s15  }
  0x23   :  { %s2731_s5 = scalar_lea.vmem %s50_s24, 768  ;;  %p2736_p2 = scmp.lt.s32.totalorder %s50_s24, %s50_s24 }
  0x24   :  { %p2732_p1 = scmp.ne.s32.totalorder %s50_s24, %s2731_s5  ;;  %p2737_p3 = scmp.lt.s32.totalorder %s2731_s5, %s2731_s5 }
  0x26   :  { %p2738_p4 = por %p2737_p3, %p2736_p2 }
  0x28   :  { %p2739_p5 = pnand %p2738_p4, %p2732_p1 }
  0x2a   :  { %2742 = shalt.err (!%p2739_p5)
}
  0x2b   :  { %55 = dma.hbm_to_vmem [thread:$0]  %s3224_s3, 768, %s50_s24, [#allocation6], %s2793_s14, %s2793_s14, %s2794_s15  }
  0x2c   :  { %s2797_s29 = smov [#allocation10]  }
  0x2d   :  { %s77_s30 = sshll.u32 %s2797_s29, 4  ;;  %s78_s30 = int_to_ptr.vmem [resolvable:$true] %s77_s30 }
  0x2e   :  { %s2751_s10 = scalar_lea.vmem %s78_s30, 3072  ;;  %p2756_p7 = scmp.lt.s32.totalorder %s78_s30, %s78_s30 }
  0x2f   :  { %p2752_p6 = scmp.ne.s32.totalorder %s78_s30, %s2751_s10  ;;  %p2757_p8 = scmp.lt.s32.totalorder %s2751_s10, %s2751_s10 }
  0x31   :  { %p2758_p9 = por %p2757_p8, %p2756_p7 }
  0x33   :  { %p2759_p10 = pnand %p2758_p9, %p2752_p6 }
  0x35   :  { %2762 = shalt.err (!%p2759_p10)
}
  0x36   :  { %83 = dma.hbm_to_vmem [thread:$0]  %s3228_s7, 3072, %s78_s30, [#allocation9], %s2793_s14, %s2793_s14, %s2794_s15  }
  0x37   :  { %2783 = dma.done.wait [#allocation3], 256  }
  0x38   :  { %2784 = vsyncadd [#allocation3], 4294967040 }
  0x39   :  { %2785 = dma.done.wait [#allocation6], 1280  }
  0x3a   :  { %2786 = vsyncadd [#allocation6], 4294966016 }
  0x3b   :  { %2787 = dma.done.wait [#allocation9], 4096  }
  0x3c   :  { %2788 = vsyncadd [#allocation9], 4294963200  ;;  %v2885_v0 = vld [vmem:[#allocation2 + $0x8] sm:$0xff]   ;;  %v2887_v1 = vld [vmem:[#allocation2] sm:$0xff]   ;;  %s2798_s3 = smov 32   ;;  %s2799_s7 = smov 96   ;;  %v153_v33 = vlaneseq }
  0x3d   :  { %v894_v2 = vrot.slane %v2885_v0, 1  ;;  %v126_v3 = vshll.u32 %v2885_v0, 16  ;;  %v2621_v4 = vld [vmem:[#allocation8 + $0x38] sm:$0xff]   ;;  %v117_v5 = vshrl.u32 %v2887_v1, 16  ;;  %v119_v6 = vshll.u32 %v2887_v1, 16  ;;  %v2622_v8 = vld [vmem:[#allocation8 + $0x30] sm:$0xff]  }
  0x3e   :  { %v124_v7 = vshrl.u32 %v2885_v0, 16  ;;  %v893_v9 = vrot.slane %v2887_v1, 1  ;;  %2565 = vmatprep.subr.bf16.mxu0 %v2621_v4  ;;  %v2623_v19 = vld [vmem:[#allocation8 + $0x28] sm:$0xff]   ;;  %v2625_v22 = vld [vmem:[#allocation8 + $0x20] sm:$0xff]   ;;  %v2627_v24 = vld [vmem:[#allocation8 + $0x18] sm:$0xff]   ;;  %v2900_v35 = vshrl.u32 %v153_v33, 7 }
  0x3f   :  { %897 = vrot.lane.b32.xlu1 %v894_v2, %s2793_s14  ;;  %v128_v10 = vrot.slane %v126_v3, 1  ;;  %v121_v11 = vrot.slane %v119_v6, 1  ;;  %v1355_v12 = vrot.slane %v117_v5, 1  ;;  %v1356_v13 = vrot.slane %v119_v6, 2  ;;  %2566 = vmatpush3.bf16.msra.mxu0 %v2621_v4  ;;  %v2624_v21 = vld [vmem:[#allocation5 + $0x18] sm:$0xff]   ;;  %v2626_v23 = vld [vmem:[#allocation5 + $0x10] sm:$0xff]  }
  0x40   :  { %v1358_v14 = vrot.slane %v124_v7, 1  ;;  %2567 = vmatprep.subr.bf16.mxu0 %v2622_v8  ;;  %v1359_v18 = vrot.slane %v126_v3, 2  ;;  %2537 = vmatprep.subr.bf16.mxu1 %v2624_v21  ;;  %v2628_v25 = vld [vmem:[#allocation5 + $0x8] sm:$0xff]   ;;  %v2629_v26 = vld [vmem:[#allocation8 + $0x10] sm:$0xff]   ;;  %v2631_v28 = vld [vmem:[#allocation8 + $0x8] sm:$0xff]   ;;  %vm134_vm0 = vcmask 261120  }
  0x41   :  { %v122_v15 = vor.u32 %v121_v11, %v117_v5  ;;  %v1357_v16 = vor.u32 %v1356_v13, %v1355_v12  ;;  %v129_v17 = vor.u32 %v128_v10, %v124_v7  ;;  %2538 = vmatpush3.bf16.msra.mxu1 %v2624_v21  ;;  %v2630_v27 = vld [vmem:[#allocation5] sm:$0xff]   ;;  %v2897_v29 = vld [vmem:[#allocation7 + $0x28] sm:$0xff]   ;;  %v2633_v30 = vld [vmem:[#allocation8] sm:$0xff]   ;;  %v2800_v31 = vmov 1966171168  }
  0x42   :  { %v1360_v20 = vor.u32 %v1359_v18, %v1358_v14  ;;  %2539 = vmatprep.subr.bf16.mxu1 %v2626_v23  ;;  %v151_v32 = vunpack.c.l.s4 %v2800_v31  ;;  %vm413_vm1 = vcmask 523264   ;;  %vm1138_vm2 = vcmask 785408  }
  0x43   :  { %895 = vrot.lane.b32.xlu1 %v893_v9, %s2793_s14  ;;  %130 = vrot.lane.b32.xlu0 %v122_v15, %s2798_s3  ;;  %vm2802_vm3 = vmmov 0   ;;  %vm865_vm4 = vcmask 1046528   ;;  %vm2062_vm5 = vcmask 1044480   ;;  %vm1327_vm6 = vcmask 1045504  }
  0x44   :  { %2568 = vmatpush3.bf16.msra.mxu0 %v2622_v8  ;;  %v152_v34 = vunpack.c.0.s8 %v151_v32  ;;  %vm2093_vm7 = vcmask 1041409  }
  0x45   :  { %2569 = vmatprep.subr.bf16.mxu0 %v2623_v19  ;;  %2540 = vmatpush3.bf16.msra.mxu1 %v2626_v23 }
  0x46   :  { %2541 = vmatprep.subr.bf16.mxu1 %v2628_v25  ;;  %v2903_v37 = vsub.s32 %v152_v34, %v2900_v35 }
  0x47   :  { %1361 = vrot.lane.b32.xlu1 %v1357_v16, %s2799_s7  ;;  %132 = vrot.lane.b32.xlu0 %v129_v17, %s2798_s3 }
  0x48   :  { %2570 = vmatpush3.bf16.msra.mxu0 %v2623_v19 }
  0x49   :  { %2571 = vmatprep.subr.bf16.mxu0 %v2625_v22  ;;  %2542 = vmatpush3.bf16.msra.mxu1 %v2628_v25 }
  0x4a   :  { %2543 = vmatprep.subr.bf16.mxu1 %v2630_v27 }
  0x4b   :  { %1363 = vrot.lane.b32.xlu0 %v1360_v20, %s2799_s7 }
  0x4c   :  { %2572 = vmatpush3.bf16.msra.mxu0 %v2625_v22 }
  0x4d   :  { %2573 = vmatprep.subr.bf16.mxu0 %v2627_v24  ;;  %2544 = vmatpush3.bf16.msra.mxu1 %v2630_v27 }
  0x4e   :  { %2549 = vmatprep.subr.bf16.mxu1 %v2897_v29 }
  0x50   :  { %2574 = vmatpush3.bf16.msra.mxu0 %v2627_v24 }
  0x51   :  { %2575 = vmatprep.subr.bf16.mxu0 %v2629_v26 }
  0x54   :  { %2576 = vmatpush3.bf16.msra.mxu0 %v2629_v26 }
  0x55   :  { %2577 = vmatprep.subr.bf16.mxu0 %v2631_v28 }
  0x58   :  { %2578 = vmatpush3.bf16.msra.mxu0 %v2631_v28 }
  0x59   :  { %2579 = vmatprep.subr.bf16.mxu0 %v2633_v30 }
  0x5c   :  { %2580 = vmatpush3.bf16.msra.mxu0 %v2633_v30 }
  0xb1   :  { %v898_v36 = vpop.permute.xlu1 %897 }
  0xb5   :  { %v896_v38 = vpop.permute.xlu1 %895  ;;  %v131_v39 = vpop.permute.xlu0 %130 }
  0xb6   :  { %v136_v40 = vsel %vm134_vm0, %v2887_v1, %v131_v39 }
  0xb7   :  { %v149_v41 = vcombine.high %v136_v40, %v136_v40  ;;  %v156_v42 = vrot.slane %v136_v40, %v2903_v37  ;;  %v900_v43 = vsel %vm413_vm1, %v136_v40, %v896_v38 }
  0xb8   :  { %v917_v45 = vcombine.high %v900_v43, %v900_v43  ;;  %v924_v46 = vrot.slane %v900_v43, %v2903_v37 }
  0xb9   :  { %v1362_v44 = vpop.permute.xlu1 %1361  ;;  %v163_v47 = vrot.slane %v149_v41, %v2903_v37  ;;  %v164_v49 = vcombine.high %v156_v42, %v156_v42  ;;  %v133_v59 = vpop.permute.xlu0 %132  ;;  %v172_v1 = vrot.slane %v156_v42, %v2903_v37 }
  0xba   :  { %v1366_v48 = vsel %vm1138_vm2, %v900_v43, %v1362_v44  ;;  %v931_v50 = vrot.slane %v917_v45, %v2903_v37  ;;  %v932_v51 = vcombine.high %v924_v46, %v924_v46  ;;  %v940_v61 = vrot.slane %v924_v46, %v2903_v37 }
  0xbb   :  { %v165_v52 = vcombine.high %v163_v47, %v163_v47  ;;  %v1387_v53 = vcombine.high %v1366_v48, %v1366_v48  ;;  %v1394_v54 = vrot.slane %v1366_v48, %v2903_v37  ;;  %v2915_v55 = vrot.slane %v163_v47, %v2903_v37 }
  0xbc   :  { %v933_v56 = vcombine.high %v931_v50, %v931_v50  ;;  %v954_v57 = vrot.slane %v932_v51, %v2903_v37  ;;  %v186_v58 = vrot.slane %v164_v49, %v2903_v37  ;;  %v2926_v3 = vrot.slane %v931_v50, %v2903_v37 }
  0xbd   :  { %v193_v60 = vrot.slane %v165_v52, %v2903_v37  ;;  %v1401_v62 = vrot.slane %v1387_v53, %v2903_v37  ;;  %v1402_v63 = vcombine.high %v1394_v54, %v1394_v54  ;;  %v195_v2 = vcombine.high %v2915_v55, %v2915_v55  ;;  %v1364_v38 = vpop.permute.xlu0 %1363 }
  0xbe   :  { %v2929_v4 = vrot.slane %v933_v56, %v2903_v37  ;;  %v1013_v5 = vcombine.low %v940_v61, %v954_v57  ;;  %v2427_v6 = vcombine.high %v940_v61, %v954_v57  ;;  %v138_v7 = vsel %vm134_vm0, %v2885_v0, %v133_v59 }
  0xbf   :  { %v292_v8 = vcombine.low %v172_v1, %v186_v58  ;;  %v2416_v9 = vcombine.high %v172_v1, %v186_v58  ;;  %v198_v10 = vcombine.high %v138_v7, %v138_v7  ;;  %v205_v11 = vrot.slane %v138_v7, %v2903_v37 }
  0xc0   :  { %v197_v12 = vcombine.high %v193_v60, %v193_v60  ;;  %v1403_v13 = vcombine.high %v1401_v62, %v1401_v62  ;;  %v2935_v14 = vrot.slane %v1401_v62, %v2903_v37  ;;  %v2938_v15 = vrot.slane %v1402_v63, %v2903_v37 }
  0xc1   :  { %v212_v16 = vrot.slane %v198_v10, %v2903_v37  ;;  %v213_v17 = vcombine.high %v205_v11, %v205_v11  ;;  %v221_v18 = vrot.slane %v205_v11, %v2903_v37  ;;  %v2943_v0 = vsel %vm413_vm1, %v138_v7, %v898_v36 }
  0xc2   :  { %v1015_v19 = vcombine.low %v2926_v3, %v2929_v4  ;;  %v2948_v20 = vrot.slane %v1013_v5, %v2903_v37  ;;  %v2951_v21 = vrot.slane %v2427_v6, %v2903_v37  ;;  %v2954_v22 = vrot.slane %v1394_v54, %v2903_v37 }
  0xc3   :  { %v214_v23 = vcombine.high %v212_v16, %v212_v16  ;;  %v228_v24 = vrot.slane %v212_v16, %v2903_v37  ;;  %v235_v25 = vrot.slane %v213_v17, %v2903_v37  ;;  %v243_v26 = vcombine.high %v221_v18, %v221_v18 }
  0xc4   :  { %v2959_v27 = vrot.slane %v1403_v13, %v2903_v37  ;;  %v1433_v28 = vcombine.high %v2935_v14, %v2935_v14  ;;  %v963_v30 = vcombine.high %v2926_v3, %v2926_v3  ;;  %v2967_v31 = vrot.slane %v2943_v0, %v2903_v37 }
  0xc5   :  { %v1522_v32 = vcombine.low %v2954_v22, %v2938_v15  ;;  %v242_v33 = vrot.slane %v214_v23, %v2903_v37  ;;  %v245_v34 = vcombine.high %v235_v25, %v235_v25  ;;  %v265_v36 = vunpack.i.h.s16 %v235_v25 }
  0xc6   :  { %v263_v39 = vunpack.i.h.s16 %v221_v18  ;;  %v294_v40 = vcombine.low %v2915_v55, %v193_v60  ;;  %v302_v41 = vrot.slane %v292_v8, %v2903_v37  ;;  %v309_v42 = vrot.slane %v2416_v9, %v2903_v37 }
  0xc7   :  { %v2444_v43 = vcombine.high %v2954_v22, %v2938_v15  ;;  %v244_v44 = vcombine.high %v228_v24, %v228_v24  ;;  %v267_v45 = vunpack.i.h.s16 %v243_v26  ;;  %v269_v46 = vunpack.i.h.s16 %v245_v34 }
  0xc8   :  { %v271_v47 = vunpack.i.h.s16 %v228_v24  ;;  %v2408_v48 = vpack.i.b16 %v221_v18, %v197_v12  ;;  %v2979_v49 = vrot.slane %v2967_v31, %v2903_v37  ;;  %v1368_v50 = vsel %vm1138_vm2, %v2943_v0, %v1364_v38 }
  0xc9   :  { %v273_v51 = vunpack.i.h.s16 %v242_v33  ;;  %v2410_v52 = vpack.i.b16 %v243_v26, %v265_v36  ;;  %v2412_v53 = vpack.i.b16 %v228_v24, %v269_v46  ;;  %v965_v54 = vcombine.high %v2943_v0, %v2943_v0 }
  0xca   :  { %v2409_v55 = vpack.i.b16 %v235_v25, %v263_v39  ;;  %v2986_v56 = vcombine.low %v963_v30, %v2979_v49  ;;  %v316_v57 = vrot.slane %v294_v40, %v2903_v37  ;;  %v324_v58 = vcombine.low %v302_v41, %v309_v42 }
  0xcb   :  { %v246_v59 = vcombine.high %v242_v33, %v242_v33  ;;  %v275_v60 = vunpack.i.h.s16 %v244_v44  ;;  %v2411_v61 = vpack.i.b16 %v245_v34, %v267_v45  ;;  %v1435_v62 = vcombine.high %v1368_v50, %v1368_v50 }
  0xcc   :  { %v2413_v63 = vpack.i.b16 %v242_v33, %v271_v47  ;;  %v980_v1 = vcombine.high %v2967_v31, %v2967_v31  ;;  %v1442_v5 = vrot.slane %v1368_v50, %v2903_v37  ;;  %v295_v6 = vcombine.low %v195_v2, %v2408_v48 }
  0xcd   :  { %v2414_v7 = vpack.i.b16 %v244_v44, %v273_v51  ;;  %v341_v8 = vcombine.low %v2409_v55, %v2410_v52  ;;  %v342_v9 = vcombine.low %v2411_v61, %v2412_v53  ;;  %v1449_v10 = vrot.slane %v1435_v62, %v2903_v37 }
  0xce   :  { %v1044_v11 = vrot.slane %v2986_v56, %v2903_v37  ;;  %v1450_v12 = vcombine.high %v1442_v5, %v1442_v5  ;;  %v1458_v13 = vrot.slane %v1442_v5, %v2903_v37  ;;  %v323_v16 = vrot.slane %v295_v6, %v2903_v37 }
  0xcf   :  { %v1451_v17 = vcombine.high %v1449_v10, %v1449_v10  ;;  %v1465_v18 = vrot.slane %v1449_v10, %v2903_v37  ;;  %v332_v23 = vrot.slane %v324_v58, %v2903_v37  ;;  %v2415_v24 = vpack.i.b16 %v246_v59, %v275_v60 }
  0xd0   :  { %v1472_v2 = vrot.slane %v1450_v12, %v2903_v37  ;;  %v1480_v25 = vcombine.high %v1458_v13, %v1458_v13  ;;  %v1497_v26 = vunpack.i.h.s16 %v1458_v13  ;;  %v2437_v30 = vpack.i.b16 %v1458_v13, %v1433_v28  ;;  %v2634_v12 = vld [vmem:[#allocation7 + $0x20] sm:$0xff]  }
  0xd1   :  { %v1479_v31 = vrot.slane %v1451_v17, %v2903_v37  ;;  %v1481_v33 = vcombine.high %v1465_v18, %v1465_v18  ;;  %v1505_v34 = vunpack.i.h.s16 %v1465_v18  ;;  %v325_v36 = vcombine.low %v316_v57, %v323_v16 }
  0xd2   :  { %v1482_v38 = vcombine.high %v1472_v2, %v1472_v2  ;;  %v1499_v39 = vunpack.i.h.s16 %v1472_v2  ;;  %v1501_v40 = vunpack.i.h.s16 %v1480_v25  ;;  %v343_v41 = vcombine.low %v2413_v63, %v2414_v7 }
  0xd3   :  { %v1507_v42 = vunpack.i.h.s16 %v1479_v31  ;;  %v2442_v44 = vpack.i.b16 %v1479_v31, %v1505_v34  ;;  %v339_v45 = vrot.slane %v325_v36, %v2903_v37  ;;  %v350_v46 = vrot.slane %v341_v8, %v2903_v37 }
  0xd4   :  { %v1503_v47 = vunpack.i.h.s16 %v1482_v38  ;;  %v2439_v48 = vpack.i.b16 %v1480_v25, %v1499_v39  ;;  %v2440_v50 = vpack.i.b16 %v1482_v38, %v1501_v40  ;;  %v357_v28 = vrot.slane %v342_v9, %v2903_v37  ;;  %v2637_v40 = vld [vmem:[#allocation7 + $0x8] sm:$0xff]  }
  0xd5   :  { %v340_v51 = vcombine.low %v332_v23, %v339_v45  ;;  %v364_v52 = vrot.slane %v343_v41, %v2903_v37  ;;  %v371_v53 = vrot.slane %v2415_v24, %v2903_v37  ;;  %v2438_v55 = vpack.i.b16 %v1472_v2, %v1497_v26  ;;  %v2635_v2 = vld [vmem:[#allocation7 + $0x18] sm:$0xff]  }
  0xd6   :  { %v2441_v56 = vpack.i.b16 %v1465_v18, %v1503_v47  ;;  %v372_v57 = vcombine.low %v350_v46, %v357_v28  ;;  %v1524_v58 = vcombine.low %v2935_v14, %v2959_v27  ;;  %v1532_v59 = vrot.slane %v1522_v32, %v2903_v37 }
  0xd7   :  { %2545 = vmatprep.mubr.msk.bf16.mxu1 %vm413_vm1, %v340_v51  ;;  %v373_v60 = vcombine.low %v364_v52, %v371_v53  ;;  %v1525_v61 = vcombine.low %v2437_v30, %v2438_v55  ;;  %v1539_v62 = vrot.slane %v2444_v43, %v2903_v37  ;;  %v1037_v63 = vrot.slane %v1015_v19, %v2903_v37  ;;  %v2640_v51 = vld [vmem:[#allocation10 + $0xb0] sm:$0xff]   ;;  %v2641_v52 = vld [vmem:[#allocation10 + $0xa8] sm:$0xff]   ;;  %v2642_v53 = vld [vmem:[#allocation10 + $0x78] sm:$0xff]  }
  0xd8   :  { %v380_v14 = vrot.slane %v372_v57, %v2903_v37  ;;  %v1546_v27 = vrot.slane %v1524_v58, %v2903_v37  ;;  %v1045_v32 = vcombine.low %v2948_v20, %v2951_v21  ;;  %v2443_v5 = vpack.i.b16 %v1481_v33, %v1507_v42  ;;  %v2636_v33 = vld [vmem:[#allocation7 + $0x10] sm:$0xff]   ;;  %v2643_v55 = vld [vmem:[#allocation10 + $0x38] sm:$0xff]   ;;  %v2645_v57 = vld [vmem:[#allocation10 + $0x70] sm:$0xff]  }
  0xd9   :  { %v387_v6 = vrot.slane %v373_v60, %v2903_v37  ;;  %v1553_v7 = vrot.slane %v1525_v61, %v2903_v37  ;;  %v1554_v8 = vcombine.low %v1532_v59, %v1539_v62  ;;  %v1046_v15 = vcombine.low %v1037_v63, %v1044_v11  ;;  %v2646_v58 = vld [vmem:[#allocation10 + $0x30] sm:$0xff]   ;;  %v2647_v59 = vld [vmem:[#allocation10 + $0x98] sm:$0xff]   ;;  %v2648_v60 = vld [vmem:[#allocation10 + $0x68] sm:$0xff]  }
  0xda   :  { %v1002_v22 = vrot.slane %v980_v1, %v2903_v37  ;;  %v1571_v43 = vcombine.low %v2439_v48, %v2440_v50  ;;  %v1572_v9 = vcombine.low %v2441_v56, %v2442_v44  ;;  %v1053_v19 = vrot.slane %v1045_v32, %v2903_v37  ;;  %v2639_v50 = vld [vmem:[#allocation10 + $0xb8] sm:$0xff]   ;;  %v2644_v56 = vld [vmem:[#allocation10 + $0xa0] sm:$0xff]   ;;  %v2649_v61 = vld [vmem:[#allocation10 + $0x28] sm:$0xff]  }
  0xdb   :  { %v388_v3 = vcombine.low %v380_v14, %v387_v6  ;;  %v1555_v4 = vcombine.low %v1546_v27, %v1553_v7  ;;  %v1060_v10 = vrot.slane %v1046_v15, %v2903_v37  ;;  %v1593_v13 = vrot.slane %v2443_v5, %v2903_v37  ;;  %v2650_v62 = vld [vmem:[#allocation10 + $0x90] sm:$0xff]   ;;  %v2651_v63 = vld [vmem:[#allocation10 + $0x60] sm:$0xff]   ;;  %v2653_v27 = vld [vmem:[#allocation10 + $0x88] sm:$0xff]  }
  0xdc   :  { %v1579_v20 = vrot.slane %v1571_v43, %v2903_v37  ;;  %v1586_v21 = vrot.slane %v1572_v9, %v2903_v37  ;;  %v979_v1 = vrot.slane %v965_v54, %v2903_v37  ;;  %v1562_v11 = vrot.slane %v1554_v8, %v2903_v37  ;;  %v2652_v14 = vld [vmem:[#allocation10 + $0x20] sm:$0xff]   ;;  %v2654_v32 = vld [vmem:[#allocation10 + $0x58] sm:$0xff]   ;;  %v2657_v7 = vld [vmem:[#allocation10 + $0x50] sm:$0xff]  }
  0xdd   :  { %2546 = vmatmul.mubr.msk.bf16.vlgmr.msra.gmra.mxu1 %vm413_vm1, %v388_v3  ;;  %v1569_v16 = vrot.slane %v1555_v4, %v2903_v37  ;;  %v1061_v17 = vcombine.low %v1053_v19, %v1060_v10  ;;  %v1012_v23 = vcombine.high %v1002_v22, %v1002_v22  ;;  %v1608_v0 = vrot.slane %v1593_v13, %v2903_v37  ;;  %v2655_v5 = vld [vmem:[#allocation10 + $0x18] sm:$0xff]   ;;  %v2656_v6 = vld [vmem:[#allocation10 + $0x80] sm:$0xff]   ;;  %v2658_v8 = vld [vmem:[#allocation10 + $0x10] sm:$0xff]  }
  0xde   :  { %2550 = vmatpush3.bf16.msra.mxu1 %v2897_v29  ;;  %v1594_v18 = vcombine.low %v1579_v20, %v1586_v21  ;;  %v981_v54 = vcombine.high %v979_v1, %v979_v1  ;;  %v995_v26 = vrot.slane %v979_v1, %v2903_v37  ;;  %v1010_v30 = vcombine.high %v2979_v49, %v2979_v49  ;;  %v2638_v49 = vld [vmem:[#allocation7] sm:$0xff]   ;;  %v2659_v15 = vld [vmem:[#allocation10 + $0x48] sm:$0xff]   ;;  %v2661_v43 = vld [vmem:[#allocation10 + $0x40] sm:$0xff]  }
  0xdf   :  { %v1570_v24 = vcombine.low %v1562_v11, %v1569_v16  ;;  %2561 = vmatprep.mubr.msk.bf16.mxu1 %vm1138_vm2, %v1061_v17  ;;  %2551 = vmatprep.subr.bf16.mxu1 %v2634_v12  ;;  %v2801_v28 = vmov 0.0   ;;  %v2662_v9 = vld [vmem:[#allocation10] sm:$0xff]  }
  0xe0   :  { %v1601_v25 = vrot.slane %v1594_v18, %v2903_v37  ;;  %v1063_v31 = vcombine.low %v1012_v23, %v995_v26  ;;  %v1009_v34 = vrot.slane %v981_v54, %v2903_v37  ;;  %v1011_v36 = vcombine.high %v995_v26, %v995_v26  ;;  %2585 = vmatprep.subr.bf16.mxu0 %v2801_v28 }
  0xe1   :  { %2581 = vmatprep.mubr.bf16.mxu0 %v1570_v24  ;;  %v1062_v38 = vcombine.low %v1002_v22, %v1010_v30  ;;  %v2660_v22 = vld [vmem:[#allocation10 + $0x8] sm:$0xff]  }
  0xe2   :  { %2552 = vmatpush3.bf16.msra.mxu1 %v2634_v12  ;;  %v1609_v29 = vcombine.low %v1601_v25, %v1608_v0  ;;  %v1078_v39 = vrot.slane %v1063_v31, %v2903_v37  ;;  %v1064_v41 = vcombine.low %v1009_v34, %v1011_v36 }
  0xe3   :  { %2553 = vmatprep.subr.bf16.mxu1 %v2635_v2  ;;  %v1071_v42 = vrot.slane %v1062_v38, %v2903_v37  ;;  %v2803_v38 = vmov 1983009808  }
  0xe4   :  { %2582 = vmatmul.mubr.bf16.vlgmr.msra.gmra.mxu0 %v1609_v29  ;;  %v1085_v45 = vrot.slane %v1064_v41, %v2903_v37 }
  0xe5   :  { %v1086_v44 = vcombine.low %v1071_v42, %v1078_v39  ;;  %2586 = vmatpush3.bf16.msra.mxu0 %v2639_v50  ;;  %2601 = vmatprep.mubr.msk.bf16.mxu0 %vm2802_vm3, %v2801_v28  ;;  %v1200_v39 = vunpack.c.l.s4 %v2803_v38 }
  0xe6   :  { %2554 = vmatpush3.bf16.msra.mxu1 %v2635_v2  ;;  %v1100_v47 = vrot.slane %v1085_v45, %v2903_v37  ;;  %2587 = vmatprep.subr.bf16.mxu0 %v2801_v28 }
  0xe7   :  { %2555 = vmatprep.subr.bf16.mxu1 %v2636_v33  ;;  %v1093_v46 = vrot.slane %v1086_v44, %v2903_v37 }
  0xe9   :  { %v1101_v48 = vcombine.low %v1093_v46, %v1100_v47  ;;  %2588 = vmatpush3.bf16.msra.mxu0 %v2640_v51 }
  0xea   :  { %2556 = vmatpush3.bf16.msra.mxu1 %v2636_v33  ;;  %2589 = vmatprep.subr.bf16.mxu0 %v2801_v28 }
  0xeb   :  { %2557 = vmatprep.subr.bf16.mxu1 %v2637_v40 }
  0xed   :  { %2590 = vmatpush3.bf16.msra.mxu0 %v2641_v52 }
  0xee   :  { %2558 = vmatpush3.bf16.msra.mxu1 %v2637_v40  ;;  %2591 = vmatprep.subr.bf16.mxu0 %v2801_v28 }
  0xef   :  { %2559 = vmatprep.subr.bf16.mxu1 %v2638_v49 }
  0xf1   :  { %2592 = vmatpush3.bf16.msra.mxu0 %v2644_v56 }
  0xf2   :  { %2560 = vmatpush3.bf16.msra.mxu1 %v2638_v49  ;;  %2593 = vmatprep.subr.bf16.mxu0 %v2801_v28 }
  0xf3   :  { %2506 = vmatprep.subr.bf16.mxu1 %v2642_v53 }
  0xf5   :  { %2562 = vmatmul.mubr.msk.bf16.vlgmr.msra.gmra.mxu1 %vm1138_vm2, %v1101_v48  ;;  %2594 = vmatpush3.bf16.msra.mxu0 %v2647_v59 }
  0xf6   :  { %2507 = vmatpush3.bf16.msra.mxu1 %v2643_v55  ;;  %2595 = vmatprep.subr.bf16.mxu0 %v2801_v28 }
  0xf7   :  { %2508 = vmatprep.subr.bf16.mxu1 %v2645_v57 }
  0xf9   :  { %2596 = vmatpush3.bf16.msra.mxu0 %v2650_v62 }
  0xfa   :  { %2509 = vmatpush3.bf16.msra.mxu1 %v2646_v58  ;;  %2597 = vmatprep.subr.bf16.mxu0 %v2801_v28 }
  0xfb   :  { %2510 = vmatprep.subr.bf16.mxu1 %v2648_v60 }
  0xfd   :  { %2598 = vmatpush3.bf16.msra.mxu0 %v2653_v27 }
  0xfe   :  { %2511 = vmatpush3.bf16.msra.mxu1 %v2649_v61  ;;  %2599 = vmatprep.subr.bf16.mxu0 %v2801_v28  ;;  %v1201_v61 = vunpack.c.0.s8 %v1200_v39 }
  0xff   :  { %2512 = vmatprep.subr.bf16.mxu1 %v2651_v63 }
 0x101   :  { %2600 = vmatpush3.bf16.msra.mxu0 %v2656_v6 }
 0x102   :  { %2513 = vmatpush3.bf16.msra.mxu1 %v2652_v14 }
 0x103   :  { %2514 = vmatprep.subr.bf16.mxu1 %v2654_v32 }
 0x106   :  { %2515 = vmatpush3.bf16.msra.mxu1 %v2655_v5 }
 0x107   :  { %2516 = vmatprep.subr.bf16.mxu1 %v2657_v7 }
 0x10a   :  { %2517 = vmatpush3.bf16.msra.mxu1 %v2658_v8 }
 0x10b   :  { %2518 = vmatprep.subr.bf16.mxu1 %v2659_v15 }
 0x10e   :  { %2519 = vmatpush3.bf16.msra.mxu1 %v2660_v22 }
 0x10f   :  { %2520 = vmatprep.subr.bf16.mxu1 %v2661_v43 }
 0x112   :  { %2521 = vmatpush3.bf16.msra.mxu1 %v2662_v9 }
 0x19d   :  { %v2547_v3 = vpop.f32.mrf.mxu1 }
 0x19e   :  { %v571_v4 = vcombine.high %v2547_v3, %v2547_v3  ;;  %v578_v19 = vrot.slane %v2547_v3, %v2903_v37 }
 0x19f   :  { %v454_v10 = vpop.f32.mrf.mxu1 }
 0x1a0   :  { %v585_v12 = vrot.slane %v571_v4, %v2903_v37  ;;  %v586_v20 = vcombine.high %v578_v19, %v578_v19  ;;  %v473_v21 = vcombine.high %v454_v10, %v454_v10  ;;  %v480_v13 = vrot.slane %v454_v10, %v2903_v37 }
 0x1a1   :  { %v2548_v1 = vpop.f32.mrf.mxu1  ;;  %v3061_v2 = vrot.slane %v578_v19, %v2903_v37 }
 0x1a2   :  { %v587_v11 = vcombine.high %v585_v12, %v585_v12  ;;  %v601_v16 = vrot.slane %v585_v12, %v2903_v37  ;;  %v608_v17 = vrot.slane %v586_v20, %v2903_v37  ;;  %v487_v18 = vrot.slane %v473_v21, %v2903_v37 }
 0x1a3   :  { %v488_v23 = vcombine.high %v480_v13, %v480_v13  ;;  %v620_v24 = vcombine.high %v2548_v1, %v2548_v1  ;;  %v496_v30 = vrot.slane %v480_v13, %v2903_v37  ;;  %v627_v31 = vrot.slane %v2548_v1, %v2903_v37  ;;  %v457_v32 = vpop.f32.mrf.mxu1 }
 0x1a4   :  { %v615_v25 = vrot.slane %v587_v11, %v2903_v37  ;;  %v617_v0 = vcombine.high %v601_v16, %v601_v16  ;;  %v618_v54 = vcombine.high %v608_v17, %v608_v17  ;;  %v489_v26 = vcombine.high %v487_v18, %v487_v18  ;;  %v2583_v57 = vpop.f32.mrf.mxu0 }
 0x1a5   :  { %v510_v29 = vrot.slane %v488_v23, %v2903_v37  ;;  %v503_v36 = vrot.slane %v487_v18, %v2903_v37  ;;  %v634_v49 = vrot.slane %v620_v24, %v2903_v37  ;;  %v616_v44 = vcombine.high %v3061_v2, %v3061_v2 }
 0x1a6   :  { %v766_v33 = vcombine.low %v618_v54, %v601_v16  ;;  %v767_v34 = vcombine.low %v615_v25, %v617_v0  ;;  %v517_v40 = vrot.slane %v489_v26, %v2903_v37  ;;  %v619_v45 = vcombine.high %v615_v25, %v615_v25 }
 0x1a7   :  { %v667_v41 = vcombine.low %v496_v30, %v510_v29  ;;  %v2423_v42 = vcombine.high %v496_v30, %v510_v29  ;;  %v635_v46 = vcombine.high %v627_v31, %v627_v31  ;;  %v643_v47 = vrot.slane %v627_v31, %v2903_v37 }
 0x1a8   :  { %v669_v48 = vcombine.low %v503_v36, %v517_v40  ;;  %v2424_v50 = vcombine.high %v503_v36, %v517_v40  ;;  %v788_v52 = vrot.slane %v766_v33, %v2903_v37  ;;  %v795_v53 = vrot.slane %v767_v34, %v2903_v37  ;;  %v1694_v34 = vpop.f32.mrf.mxu0 }
 0x1a9   :  { %v677_v28 = vrot.slane %v667_v41, %v2903_v37  ;;  %v684_v51 = vrot.slane %v2423_v42, %v2903_v37  ;;  %v636_v55 = vcombine.high %v634_v49, %v634_v49  ;;  %v657_v56 = vrot.slane %v635_v46, %v2903_v37 }
 0x1aa   :  { %v691_v58 = vrot.slane %v669_v48, %v2903_v37  ;;  %v698_v59 = vrot.slane %v2424_v50, %v2903_v37  ;;  %v665_v60 = vcombine.high %v643_v47, %v643_v47  ;;  %v3080_v62 = vcombine.low %v608_v17, %v616_v44 }
 0x1ab   :  { %v650_v63 = vrot.slane %v634_v49, %v2903_v37  ;;  %v666_v14 = vcombine.high %v657_v56, %v657_v56  ;;  %v813_v27 = vcombine.low %v619_v45, %v643_v47  ;;  %v699_v5 = vcombine.low %v677_v28, %v684_v51 }
 0x1ac   :  { %v700_v6 = vcombine.low %v691_v58, %v698_v59  ;;  %v814_v7 = vcombine.low %v657_v56, %v665_v60  ;;  %v1811_v8 = vcombine.high %v2583_v57, %v2583_v57  ;;  %v3083_v15 = vcombine.low %v788_v52, %v795_v53 }
 0x1ad   :  { %v664_v22 = vrot.slane %v636_v55, %v2903_v37  ;;  %v815_v43 = vcombine.low %v666_v14, %v650_v63  ;;  %v1818_v9 = vrot.slane %v2583_v57, %v2903_v37  ;;  %v822_v4 = vrot.slane %v813_v27, %v2903_v37 }
 0x1ae   :  { %v3088_v3 = vrot.slane %v700_v6, %v2903_v37  ;;  %v1825_v19 = vrot.slane %v1811_v8, %v2903_v37  ;;  %v522_v10 = vcombine.high %v457_v32, %v457_v32  ;;  %v829_v12 = vrot.slane %v814_v7, %v2903_v37 }
 0x1af   :  { %v1826_v20 = vcombine.high %v1818_v9, %v1818_v9  ;;  %v3094_v21 = vrot.slane %v1818_v9, %v2903_v37  ;;  %v529_v13 = vrot.slane %v457_v32, %v2903_v37  ;;  %v3098_v1 = vrot.slane %v699_v5, %v2903_v37 }
 0x1b0   :  { %v836_v11 = vrot.slane %v815_v43, %v2903_v37  ;;  %v1827_v16 = vcombine.high %v1825_v19, %v1825_v19  ;;  %v3102_v17 = vsub.s32 %v1201_v61, %v2900_v35  ;;  %v1841_v18 = vrot.slane %v1825_v19, %v2903_v37 }
 0x1b1   :  { %v1848_v23 = vrot.slane %v1826_v20, %v2903_v37  ;;  %v1856_v24 = vcombine.high %v3094_v21, %v3094_v21  ;;  %v536_v25 = vrot.slane %v522_v10, %v2903_v37  ;;  %v781_v0 = vrot.slane %v3080_v62, %v2903_v37  ;;  %v2584_v62 = vpop.f32.mrf.mxu0 }
 0x1b2   :  { %v811_v54 = vrot.slane %v3083_v15, %v2903_v37  ;;  %v843_v26 = vrot.slane %v664_v22, %v2903_v37  ;;  %v537_v30 = vcombine.high %v529_v13, %v529_v13  ;;  %v715_v35 = vcombine.low %v3098_v1, %v3088_v3 }
 0x1b3   :  { %v844_v29 = vcombine.low %v822_v4, %v829_v12  ;;  %v1858_v31 = vcombine.high %v1848_v23, %v1848_v23  ;;  %v538_v33 = vcombine.high %v536_v25, %v536_v25  ;;  %v545_v38 = vrot.slane %v529_v13, %v2903_v37 }
 0x1b4   :  { %v845_v36 = vcombine.low %v836_v11, %v843_v26  ;;  %v552_v39 = vrot.slane %v536_v25, %v2903_v37  ;;  %v559_v40 = vrot.slane %v537_v30, %v2903_v37  ;;  %v1855_v41 = vrot.slane %v1827_v16, %v2903_v37 }
 0x1b5   :  { %v1857_v42 = vcombine.high %v1841_v18, %v1841_v18  ;;  %v1972_v49 = vcombine.low %v1848_v23, %v1856_v24  ;;  %v566_v44 = vrot.slane %v538_v33, %v2903_v37  ;;  %v1713_v48 = vcombine.high %v1694_v34, %v1694_v34  ;;  %v2563_v26 = vpop.f32.mrf.mxu1 }
 0x1b6   :  { %v568_v45 = vcombine.high %v552_v39, %v552_v39  ;;  %v716_v46 = vcombine.low %v545_v38, %v559_v40  ;;  %v2425_v47 = vcombine.high %v545_v38, %v559_v40  ;;  %v852_v50 = vrot.slane %v844_v29, %v2903_v37 }
 0x1b7   :  { %v1973_v28 = vcombine.low %v1858_v31, %v1841_v18  ;;  %v570_v51 = vcombine.high %v566_v44, %v566_v44  ;;  %v718_v52 = vcombine.low %v552_v39, %v566_v44  ;;  %v859_v53 = vrot.slane %v845_v36, %v2903_v37 }
 0x1b8   :  { %v725_v55 = vrot.slane %v716_v46, %v2903_v37  ;;  %v732_v56 = vrot.slane %v2425_v47, %v2903_v37  ;;  %v1720_v57 = vrot.slane %v1694_v34, %v2903_v37  ;;  %v746_v59 = vrot.slane %v568_v45, %v2903_v37  ;;  %v1697_v34 = vpop.f32.mrf.mxu0 }
 0x1b9   :  { %v739_v58 = vrot.slane %v718_v52, %v2903_v37  ;;  %v764_v60 = vcombine.low %v570_v51, %v3061_v2  ;;  %v1727_v61 = vrot.slane %v1713_v48, %v2903_v37  ;;  %v1994_v63 = vrot.slane %v1972_v49, %v2903_v37  ;;  %v1179_v48 = vpop.f32.mrf.mxu1 }
 0x1ba   :  { %v2019_v14 = vcombine.low %v1855_v41, %v1857_v42  ;;  %v747_v27 = vcombine.low %v725_v55, %v732_v56  ;;  %v1728_v32 = vcombine.high %v1720_v57, %v1720_v57  ;;  %v2001_v5 = vrot.slane %v1973_v28, %v2903_v37 }
 0x1bb   :  { %v748_v6 = vcombine.low %v739_v58, %v746_v59  ;;  %v1729_v7 = vcombine.high %v1727_v61, %v1727_v61  ;;  %v1736_v8 = vrot.slane %v1720_v57, %v2903_v37  ;;  %v774_v22 = vrot.slane %v764_v60, %v2903_v37  ;;  %v2564_v3 = vpop.f32.mrf.mxu1 }
 0x1bc   :  { %v1750_v43 = vrot.slane %v1728_v32, %v2903_v37  ;;  %v1859_v9 = vcombine.high %v1855_v41, %v1855_v41  ;;  %v1866_v2 = vrot.slane %v2584_v62, %v2903_v37  ;;  %v755_v4 = vrot.slane %v747_v27, %v2903_v37 }
 0x1bd   :  { %v762_v19 = vrot.slane %v748_v6, %v2903_v37  ;;  %v1743_v10 = vrot.slane %v1727_v61, %v2903_v37  ;;  %v1757_v12 = vrot.slane %v1729_v7, %v2903_v37  ;;  %v860_v18 = vcombine.low %v852_v50, %v859_v53 }
 0x1be   :  { %v1882_v20 = vcombine.low %v1736_v8, %v1750_v43  ;;  %v2453_v13 = vcombine.high %v1736_v8, %v1750_v43  ;;  %v1867_v11 = vcombine.high %v1866_v2, %v1866_v2  ;;  %v1874_v16 = vrot.slane %v1866_v2, %v2903_v37 }
 0x1bf   :  { %v763_v23 = vcombine.low %v755_v4, %v762_v19  ;;  %v1884_v24 = vcombine.low %v1743_v10, %v1757_v12  ;;  %v2454_v25 = vcombine.high %v1743_v10, %v1757_v12  ;;  %v3141_v30 = vcombine.low %v1994_v63, %v2001_v5 }
 0x1c0   :  { %v796_v29 = vcombine.low %v774_v22, %v781_v0  ;;  %v1881_v31 = vrot.slane %v1867_v11, %v2903_v37  ;;  %v2020_v33 = vcombine.low %v1859_v9, %v1874_v16  ;;  %v1892_v36 = vrot.slane %v1882_v20, %v2903_v37 }
 0x1c1   :  { %v1899_v38 = vrot.slane %v2453_v13, %v2903_v37  ;;  %v1906_v39 = vrot.slane %v1884_v24, %v2903_v37  ;;  %v1913_v40 = vrot.slane %v2454_v25, %v2903_v37  ;;  %v866_v41 = vsel %vm865_vm4, %v763_v23, -inf  ;;  %v1182_v13 = vpop.f32.mrf.mxu1 }
 0x1c2   :  { %v2027_v42 = vrot.slane %v2019_v14, %v2903_v37  ;;  %v2034_v49 = vrot.slane %v2020_v33, %v2903_v37  ;;  %v2041_v0 = vrot.slane %v1881_v31, %v2903_v37  ;;  %v3153_v44 = vsel %vm865_vm4, %v860_v18, -inf }
 0x1c3   :  { %v1915_v45 = vcombine.low %v1906_v39, %v1913_v40  ;;  %v1762_v46 = vcombine.high %v1697_v34, %v1697_v34  ;;  %v1769_v47 = vrot.slane %v1697_v34, %v2903_v37  ;;  %v2017_v50 = vrot.slane %v3141_v30, %v2903_v37 }
 0x1c4   :  { %v804_v28 = vrot.slane %v796_v29, %v2903_v37  ;;  %v2042_v51 = vcombine.low %v2027_v42, %v2034_v49  ;;  %v1232_v52 = vcombine.high %v2563_v26, %v2563_v26  ;;  %v867_v53 = vmax.f32 %v715_v35, %v866_v41 }
 0x1c5   :  { %v1914_v55 = vcombine.low %v1892_v36, %v1899_v38  ;;  %v1776_v56 = vrot.slane %v1762_v46, %v2903_v37  ;;  %v1777_v57 = vcombine.high %v1769_v47, %v1769_v47  ;;  %v1929_v58 = vrot.slane %v1915_v45, %v2903_v37 }
 0x1c6   :  { %v2049_v59 = vrot.slane %v2042_v51, %v2903_v37  ;;  %v2056_v60 = vrot.slane %v2041_v0, %v2903_v37  ;;  %v1198_v61 = vcombine.high %v1179_v48, %v1179_v48  ;;  %v1785_v63 = vrot.slane %v1769_v47, %v2903_v37 }
 0x1c7   :  { %v1778_v62 = vcombine.high %v1776_v56, %v1776_v56  ;;  %v1792_v14 = vrot.slane %v1776_v56, %v2903_v37  ;;  %v1799_v27 = vrot.slane %v1777_v57, %v2903_v37  ;;  %v1239_v35 = vrot.slane %v2563_v26, %v3102_v17 }
 0x1c8   :  { %v2057_v1 = vcombine.low %v2049_v59, %v2056_v60  ;;  %v1246_v32 = vrot.slane %v1232_v52, %v3102_v17  ;;  %v1212_v5 = vrot.slane %v1198_v61, %v3102_v17  ;;  %v812_v43 = vcombine.low %v804_v28, %v811_v54 }
 0x1c9   :  { %v1806_v6 = vrot.slane %v1778_v62, %v2903_v37  ;;  %v1808_v7 = vcombine.high %v1792_v14, %v1792_v14  ;;  %v1931_v8 = vcombine.low %v1785_v63, %v1799_v27  ;;  %v2455_v22 = vcombine.high %v1785_v63, %v1799_v27 }
 0x1ca   :  { %v1922_v9 = vrot.slane %v1914_v55, %v2903_v37  ;;  %v1953_v2 = vrot.slane %v1792_v14, %v2903_v37  ;;  %v1205_v4 = vrot.slane %v1179_v48, %v3102_v17  ;;  %v868_v11 = vrot.slane %v867_v53, 4 }
 0x1cb   :  { %v1810_v19 = vcombine.high %v1806_v6, %v1806_v6  ;;  %v1939_v10 = vrot.slane %v1931_v8, %v2903_v37  ;;  %v1946_v12 = vrot.slane %v2455_v22, %v2903_v37  ;;  %v1970_v20 = vcombine.low %v1806_v6, %v1808_v7 }
 0x1cc   :  { %v1930_v16 = vcombine.low %v1922_v9, %v1929_v58  ;;  %v1247_v18 = vcombine.high %v1239_v35, %v1239_v35  ;;  %v1214_v23 = vcombine.high %v1212_v5, %v1212_v5  ;;  %v2071_v15 = vsel %vm2062_vm5, %v2057_v1, -inf }
 0x1cd   :  { %v1954_v54 = vcombine.low %v1939_v10, %v1946_v12  ;;  %v1971_v24 = vcombine.low %v1810_v19, %v3094_v21  ;;  %v1248_v25 = vcombine.high %v1246_v32, %v1246_v32  ;;  %v1968_v26 = vrot.slane %v1953_v2, %v2903_v37 }
 0x1ce   :  { %v1213_v29 = vcombine.high %v1205_v4, %v1205_v4  ;;  %v1255_v31 = vrot.slane %v2564_v3, %v3102_v17  ;;  %v1215_v33 = vcombine.high %v1182_v13, %v1182_v13  ;;  %v1980_v36 = vrot.slane %v1970_v20, %v2903_v37 }
 0x1cf   :  { %v1961_v34 = vrot.slane %v1954_v54, %v2903_v37  ;;  %v1987_v38 = vrot.slane %v1971_v24, %v2903_v37  ;;  %v1222_v39 = vrot.slane %v1182_v13, %v3102_v17  ;;  %v1258_v40 = vcombine.low %v1212_v5, %v1214_v23 }
 0x1d0   :  { %v1256_v41 = vcombine.high %v1255_v31, %v1255_v31  ;;  %v1307_v42 = vcombine.low %v1248_v25, %v1255_v31  ;;  %v1229_v21 = vrot.slane %v1215_v33, %v3102_v17  ;;  %v1291_v45 = vcombine.low %v1247_v18, %v1246_v32  ;;  %v2426_v31 = vld [vmem:[%s3223_s2] ss:$0 sm:$0xff] }
 0x1d1   :  { %v1969_v49 = vcombine.low %v1961_v34, %v1968_v26  ;;  %v2002_v0 = vcombine.low %v1980_v36, %v1987_v38  ;;  %v1230_v46 = vcombine.high %v1222_v39, %v1222_v39  ;;  %v1257_v47 = vcombine.low %v1205_v4, %v1213_v29  ;;  %v2456_v38 = vld [vmem:[%s3227_s6] ss:$0 sm:$0xff]  ;;  %s2804_s6 = smov [#allocation11]  }
 0x1d2   :  { %v1314_v48 = vrot.slane %v1307_v42, %v3102_v17  ;;  %v1321_v28 = vrot.slane %v1256_v41, %v3102_v17  ;;  %v1231_v51 = vcombine.high %v1229_v21, %v1229_v21  ;;  %v869_v57 = vmax.f32 %v867_v53, %v868_v11  ;;  %s2395_s18 = sshll.u32 %s2804_s6, 4  ;;  %s2396_s18 = int_to_ptr.vmem [resolvable:$true] %s2395_s18 }
 0x1d3   :  { %v2010_v52 = vrot.slane %v2002_v0, %v2903_v37  ;;  %v2063_v55 = vsel %vm2062_vm5, %v1969_v49, -inf  ;;  %v1274_v56 = vcombine.low %v1222_v39, %v1230_v46  ;;  %v1272_v59 = vrot.slane %v1258_v40, %v3102_v17  ;;  %s2763_s19 = scalar_lea.vmem %s2396_s18, 32  ;;  %p2768_p12 = scmp.lt.s32.totalorder %s2396_s18, %s2396_s18 }
 0x1d4   :  { %v2064_v58 = vmax.f32 %v1930_v16, %v2063_v55  ;;  %v1288_v60 = vrot.slane %v1229_v21, %v3102_v17  ;;  %v1290_v61 = vcombine.low %v1231_v51, %v1239_v35  ;;  %v1322_v63 = vcombine.low %v1314_v48, %v1321_v28  ;;  %p2764_p11 = scmp.ne.s32.totalorder %s2396_s18, %s2763_s19  ;;  %p2769_p13 = scmp.lt.s32.totalorder %s2763_s19, %s2763_s19 }
 0x1d5   :  { %v2018_v62 = vcombine.low %v2010_v52, %v2017_v50  ;;  %v1281_v14 = vrot.slane %v1274_v56, %v3102_v17  ;;  %v875_v27 = vmax.f32 %v812_v43, %v3153_v44  ;;  %v1305_v1 = vrot.slane %v1291_v45, %v3102_v17 }
 0x1d6   :  { %v2065_v3 = vrot.slane %v2064_v58, 4  ;;  %v1265_v53 = vrot.slane %v1257_v47, %v3102_v17  ;;  %v1298_v32 = vrot.slane %v1290_v61, %v3102_v17  ;;  %v870_v7 = vrot.slane %v869_v57, 2  ;;  %v2436_v47 = vld [vmem:[%s3225_s4] ss:$0 sm:$0xff]  ;;  %p2770_p0 = por %p2769_p13, %p2768_p12 }
 0x1d7   :  { %v2072_v5 = vmax.f32 %v2018_v62, %v2071_v15  ;;  %v1289_v6 = vcombine.low %v1281_v14, %v1288_v60  ;;  %v876_v35 = vrot.slane %v875_v27, 4  ;;  %v1336_v30 = vsel %vm1327_vm6, %v1322_v63, -inf }
 0x1d8   :  { %v2066_v8 = vmax.f32 %v2064_v58, %v2065_v3  ;;  %v1273_v22 = vcombine.low %v1265_v53, %v1272_v59  ;;  %v1306_v37 = vcombine.low %v1298_v32, %v1305_v1  ;;  %v871_v10 = vmax.f32 %v869_v57, %v870_v7  ;;  %p2771_p1 = pnand %p2770_p0, %p2764_p11 }
 0x1d9   :  { %v1328_v50 = vsel %vm1327_vm6, %v1289_v6, -inf  ;;  %v2073_v9 = vrot.slane %v2072_v5, 4  ;;  %v877_v44 = vmax.f32 %v875_v27, %v876_v35 }
 0x1da   :  { %v1329_v43 = vmax.f32 %v1273_v22, %v1328_v50  ;;  %v1337_v2 = vmax.f32 %v1306_v37, %v1336_v30  ;;  %v2067_v4 = vrot.slane %v2066_v8, 2  ;;  %v872_v24 = vrot.slane %v871_v10, 1  ;;  %v2457_v37 = vld [vmem:[%s3229_s8] ss:$0 sm:$0xff] }
 0x1db   :  { %v2074_v19 = vmax.f32 %v2072_v5, %v2073_v9  ;;  %v878_v12 = vrot.slane %v877_v44, 2 }
 0x1dc   :  { %v1330_v17 = vrot.slane %v1329_v43, 4  ;;  %v1338_v20 = vrot.slane %v1337_v2, 4  ;;  %v2068_v13 = vmax.f32 %v2066_v8, %v2067_v4  ;;  %v873_v42 = vmax.f32 %v871_v10, %v872_v24 }
 0x1dd   :  { %v2075_v11 = vrot.slane %v2074_v19, 2  ;;  %v879_v16 = vmax.f32 %v877_v44, %v878_v12 }
 0x1de   :  { %v1331_v18 = vmax.f32 %v1329_v43, %v1330_v17  ;;  %v2069_v23 = vrot.slane %v2068_v13, 1  ;;  %v1339_v15 = vmax.f32 %v1337_v2, %v1338_v20  ;;  %v889_v55 = vadd.f32 %v2426_v31, %v873_v42 }
 0x1df   :  { %v2076_v54 = vmax.f32 %v2074_v19, %v2075_v11  ;;  %v880_v25 = vrot.slane %v879_v16, 1 }
 0x1e0   :  { %v1332_v26 = vrot.slane %v1331_v18, 2  ;;  %v1340_v29 = vrot.slane %v1339_v15, 2  ;;  %v2070_v33 = vmax.f32 %v2068_v13, %v2069_v23  ;;  %v891_v63 = vmax.f32 %v889_v55, 0.0 }
 0x1e1   :  { %v2077_v34 = vrot.slane %v2076_v54, 1  ;;  %v881_v36 = vmax.f32 %v879_v16, %v880_v25 }
 0x1e2   :  { %v1333_v39 = vmax.f32 %v1331_v18, %v1332_v26  ;;  %v1341_v40 = vmax.f32 %v1339_v15, %v1340_v29  ;;  %v2086_v45 = vadd.f32 %v2456_v38, %v2070_v33 }
 0x1e3   :  { %v2078_v41 = vmax.f32 %v2076_v54, %v2077_v34  ;;  %v890_v21 = vadd.f32 %v2426_v31, %v881_v36 }
 0x1e4   :  { %v1334_v49 = vrot.slane %v1333_v39, 1  ;;  %v1342_v0 = vrot.slane %v1341_v40, 1  ;;  %v2088_v58 = vmax.f32 %v2086_v45, 0.0 }
 0x1e5   :  { %v2087_v46 = vadd.f32 %v2456_v38, %v2078_v41  ;;  %v892_v48 = vmax.f32 %v890_v21, 0.0 }
 0x1e6   :  { %v1335_v28 = vmax.f32 %v1333_v39, %v1334_v49  ;;  %v1343_v51 = vmax.f32 %v1341_v40, %v1342_v0 }
 0x1e7   :  { %v2089_v52 = vmax.f32 %v2087_v46, 0.0  ;;  %v2092_v60 = vrot.slane %v892_v48, 7 }
 0x1e8   :  { %v1351_v56 = vadd.f32 %v2436_v47, %v1335_v28  ;;  %v1352_v57 = vadd.f32 %v2436_v47, %v1343_v51 }
 0x1e9   :  { %v2103_v59 = vrot.slane %v2089_v52, 7  ;;  %v2094_v1 = vsel %vm2093_vm7, %v2092_v60, %v891_v63 }
 0x1ea   :  { %v1354_v61 = vmax.f32 %v1352_v57, 0.0  ;;  %v1353_v27 = vmax.f32 %v1351_v56, 0.0  ;;  %v2106_v5 = vpack.c.bf16 %v2094_v1, %v2094_v1 }
 0x1eb   :  { %v2104_v62 = vsel %vm2093_vm7, %v2103_v59, %v2088_v58 }
 0x1ec   :  { %v2108_v14 = vpack.c.bf16 %v2104_v62, %v2104_v62  ;;  %v2098_v3 = vrot.slane %v1354_v61, 7 }
 0x1ee   :  { %2602 = vmatmul.mubr.bf16.vlgmr.msra.gmra.mxu0 %v2108_v14  ;;  %v2099_v53 = vsel %vm2093_vm7, %v2098_v3, %v1353_v27 }
 0x1ef   :  { %v2107_v32 = vpack.c.bf16 %v2099_v53, %v2099_v53 }
 0x1f1   :  { %2340 = vmatprep.mubr.bf16.mxu1 %v2107_v32 }
 0x1f2   :  { %2341 = vmatmul.mubr.bf16.vlgmr.msra.gmra.mxu1 %v2106_v5 }
 0x2ae   :  { %v2382_v6 = vpop.f32.mrf.mxu0 }
 0x2b0   :  { %v2603_v7 = vpop.f32.mrf.mxu0 }
 0x2b2   :  { %v2385_v35 = vpop.f32.mrf.mxu0  ;;  %v2522_v8 = vpop.f32.mrf.mxu1 }
 0x2b4   :  { %v2604_v22 = vpop.f32.mrf.mxu0  ;;  %v2523_v30 = vpop.f32.mrf.mxu1 }
 0x2b5   :  { %v2524_v50 = vadd.f32 %v2523_v30, %v2522_v8 }
 0x2b6   :  { %v2525_v9 = vpop.f32.mrf.mxu1 }
 0x2b7   :  { %v2343_v44 = vadd.f32 %v2524_v50, %v2457_v37 }
 0x2b8   :  { %v2526_v43 = vpop.f32.mrf.mxu1 }
 0x2b9   :  { %v2383_v2 = vadd.f32 %v2382_v6, %v2343_v44 }
 0x2bb   :  { %2388 = vst [vmem:[#allocation11] sm:$0x3] %v2383_v2 }
 0x2bc   :  { %2774 = shalt.err (!%p2771_p1)
}
 0x2bd   :  { %2398 = dma.vmem_to_hbm [thread:$0]  %s2396_s18, 32, %s3230_s9, [#allocation4]  }
 0x2be   :  { %2789 = dma.done.wait [#allocation4], 32  }
 0x2bf   :  { %2790 = vsyncadd [#allocation4], 4294967264 }
 0x2c0   :  { %2402 = vsyncpa [#allocation3], 1 }
 0x2c1   :  { %2403 = vsyncpa [#allocation6], 1 }
 0x2c2   :  { %2404 = vsyncpa [#allocation9], 1 }
 0x2c3   :  { %2405 = vsyncpa [#allocation4], 1 }

</bundles_post_ra>
